<compile_context>
chip_gen: v5e
topology: v5e:2x2
jax: 0.10.0
libtpu: 0.0.40
codegen_flags: <defaults>
</compile_context>

<pallas_src>
import math

import jax
import jax.numpy as jnp
from jax.experimental import pallas as pl
from jax.experimental.pallas import tpu as pltpu


def _round_up(v, m):
    return ((v + m - 1) // m) * m


def _propagator_kernel(x_ref, w_ref, b_ref, o_ref, acc_ref):
    # grid = (M_tiles, N_tiles, K_tiles); K is the last ("arbitrary") axis.
    k = pl.program_id(2)

    @pl.when(k == 0)
    def _():
        acc_ref[...] = jnp.zeros_like(acc_ref)

    acc_ref[...] += jnp.dot(x_ref[...], w_ref[...],
                            preferred_element_type=jnp.float32)

    @pl.when(k == pl.num_programs(2) - 1)
    def _():
        y = acc_ref[...] + b_ref[...].astype(jnp.float32)
        o_ref[...] = jnp.maximum(y, 0.0).astype(o_ref.dtype)


def _propagator_residual_kernel(x_ref, w_ref, b_ref, r_ref, o_ref, acc_ref):
    k = pl.program_id(2)

    @pl.when(k == 0)
    def _():
        acc_ref[...] = jnp.zeros_like(acc_ref)

    acc_ref[...] += jnp.dot(x_ref[...], w_ref[...],
                            preferred_element_type=jnp.float32)

    @pl.when(k == pl.num_programs(2) - 1)
    def _():
        y = (acc_ref[...] + b_ref[...].astype(jnp.float32)
             + r_ref[...].astype(jnp.float32))
        o_ref[...] = jnp.maximum(y, 0.0).astype(o_ref.dtype)


def propagator_forward(x, weight, bias, res=None, *,
                       tm=512, tn=256, tk=256,
                       matmul_dtype=jnp.bfloat16,
                       use_pallas=None):
    """Pallas equivalent of Propagator.forward.

    x:      [..., input_size]
    weight: (output_size, input_size)   (PyTorch nn.Linear convention)
    bias:   (output_size,)
    res:    optional [..., output_size] residual (Propagator(residual=True))
    """
    in_size = x.shape[-1]
    out_size = weight.shape[0]
    lead_shape = x.shape[:-1]
    out_dtype = x.dtype

    x2 = x.reshape(-1, in_size)                       # (M, K)
    M = x2.shape[0]

    # Tiny problems: fixed pallas_call launch/pipeline overhead dominates;
    # let XLA's fused matmul+bias+relu handle them.
    if use_pallas is None:
        use_pallas = (M * in_size >= (1 << 14)) or (in_size * out_size >= (1 << 16))
    if not use_pallas:
        y = x2.astype(jnp.float32) @ weight.T.astype(jnp.float32) + bias
        if res is not None:
            y = y + res.reshape(-1, out_size).astype(jnp.float32)
        return jnp.maximum(y, 0.0).astype(out_dtype).reshape(*lead_shape, out_size)

    mm_dtype = jnp.dtype(matmul_dtype) if matmul_dtype is not None else x2.dtype

    # --- MXU / lane-aligned tile sizes and padded problem dims --------------
    tk_eff = min(tk, _round_up(in_size, 128))
    tn_eff = min(tn, _round_up(out_size, 128))
    tm_eff = min(tm, _round_up(M, 8))
    Kp = _round_up(in_size, tk_eff)
    Np = _round_up(out_size, tn_eff)
    Mp = _round_up(M, tm_eff)

    # Zero-padded, pre-cast operands. Zero padding keeps matmul/bias/residual exact.
    xp = jnp.zeros((Mp, Kp), mm_dtype).at[:M, :in_size].set(x2.astype(mm_dtype))
    wp = jnp.zeros((Kp, Np), mm_dtype).at[:in_size, :out_size].set(
        jnp.transpose(weight).astype(mm_dtype))
    bp = jnp.zeros((1, Np), jnp.float32).at[0, :out_size].set(
        bias.astype(jnp.float32))

    grid = (Mp // tm_eff, Np // tn_eff, Kp // tk_eff)

    x_spec = pl.BlockSpec((tm_eff, tk_eff), lambda i, j, k: (i, k))
    w_spec = pl.BlockSpec((tk_eff, tn_eff), lambda i, j, k: (k, j))
    b_spec = pl.BlockSpec((1, tn_eff), lambda i, j, k: (0, j))
    o_spec = pl.BlockSpec((tm_eff, tn_eff), lambda i, j, k: (i, j))

    out_shape = jax.ShapeDtypeStruct((Mp, Np), out_dtype)
    scratch = [pltpu.VMEM((tm_eff, tn_eff), jnp.float32)]

    # Explicit VMEM budget (double-buffered inputs/outputs + f32 accumulator),
    # clamped so it always fits v7x's 64 MiB per-core VMEM.
    in_bytes = jnp.dtype(mm_dtype).itemsize
    out_bytes = jnp.dtype(out_dtype).itemsize
    vmem_est = (2 * tm_eff * tk_eff * in_bytes      # x tiles
                + 2 * tk_eff * tn_eff * in_bytes    # w tiles
                + 2 * tm_eff * tn_eff * out_bytes   # out tiles
                + 2 * tn_eff * 4                    # bias tile
                + tm_eff * tn_eff * 4)              # accumulator
    if res is not None:
        vmem_est += 2 * tm_eff * tn_eff * 4         # residual tiles (f32)
    vmem_limit = int(min(max(2 * vmem_est, 32 << 20), 48 << 20))

    compiler_params = pltpu.CompilerParams(
        dimension_semantics=("parallel", "parallel", "arbitrary"),
        vmem_limit_bytes=vmem_limit)

    cost = pl.CostEstimate(
        flops=2 * Mp * Kp * Np,
        transcendentals=0,
        bytes_accessed=(Mp * Kp * in_bytes + Kp * Np * in_bytes
                        + Mp * Np * out_bytes + Np * 4
                        + (Mp * Np * 4 if res is not None else 0)))

    if res is None:
        yp = pl.pallas_call(
            _propagator_kernel,
            out_shape=out_shape,
            grid_spec=pltpu.PrefetchScalarGridSpec(
                num_scalar_prefetch=0,
                grid=grid,
                in_specs=[x_spec, w_spec, b_spec],
                out_specs=o_spec,
                scratch_shapes=scratch),
            compiler_params=compiler_params,
            cost_estimate=cost,
        )(xp, wp, bp)
    else:
        r2 = res.reshape(-1, out_size)
        rp = jnp.zeros((Mp, Np), jnp.float32).at[:M, :out_size].set(
            r2.astype(jnp.float32))
        r_spec = pl.BlockSpec((tm_eff, tn_eff), lambda i, j, k: (i, j))
        yp = pl.pallas_call(
            _propagator_residual_kernel,
            out_shape=out_shape,
            grid_spec=pltpu.PrefetchScalarGridSpec(
                num_scalar_prefetch=0,
                grid=grid,
                in_specs=[x_spec, w_spec, b_spec, r_spec],
                out_specs=o_spec,
                scratch_shapes=scratch),
            compiler_params=compiler_params,
            cost_estimate=cost,
        )(xp, wp, bp, rp)

    return yp[:M, :out_size].reshape(*lead_shape, out_size)


if __name__ == "__main__":
    key = jax.random.PRNGKey(0)

    def make_case(k, batch, n_obj, in_size, out_size):
        kx, kw, kb, kr = jax.random.split(k, 4)
        bound = 1.0 / math.sqrt(in_size)
        w = jax.random.uniform(kw, (out_size, in_size), jnp.float32, -bound, bound)
        b = jax.random.uniform(kb, (out_size,), jnp.float32, -bound, bound)
        x = jax.random.normal(kx, (batch, n_obj, in_size), jnp.float32)
        r = jax.random.normal(kr, (batch, n_obj, out_size), jnp.float32)
        return x, w, b, r

    def ref_forward(x, w, b, r=None, mm_dtype=jnp.bfloat16):
        # Same bf16-input / f32-accumulate arithmetic as the kernel.
        x2 = x.reshape(-1, x.shape[-1]).astype(mm_dtype)
        y = jnp.dot(x2, jnp.transpose(w).astype(mm_dtype),
                    preferred_element_type=jnp.float32) + b
        if r is not None:
            y = y + r.reshape(-1, w.shape[0]).astype(jnp.float32)
        y = jnp.maximum(y, 0.0).astype(x.dtype)
        return y.reshape(*x.shape[:-1], w.shape[0])

    # (batch, n_obj, input_size, output_size)
    cases = [
        (2, 8, 32, 64),      # tiny, unaligned -> exercises padding
        (2, 64, 128, 256),   # lane-aligned single-tile
        (4, 256, 320, 160),  # multi-tile M and K (accumulator path), padded N/K
    ]
    case_keys = jax.random.split(key, len(cases))

    for ck, (batch, n_obj, in_size, out_size) in zip(case_keys, cases):
        x, w, b, r = make_case(ck, batch, n_obj, in_size, out_size)

        # residual=False path (module default). Force the Pallas path so the
        # kernel is actually exercised even at demo sizes.
        y = jax.block_until_ready(propagator_forward(x, w, b, use_pallas=True))
        y_ref = ref_forward(x, w, b)
        assert y.shape == (batch, n_obj, out_size), (y.shape, (batch, n_obj, out_size))
        assert jnp.allclose(y, y_ref, atol=5e-3, rtol=5e-3), \
            f"no-residual mismatch for case {(batch, n_obj, in_size, out_size)}"

        # residual=True path
        y_r = jax.block_until_ready(
            propagator_forward(x, w, b, res=r, use_pallas=True))
        y_r_ref = ref_forward(x, w, b, r)
        assert y_r.shape == (batch, n_obj, out_size)
        assert jnp.allclose(y_r, y_r_ref, atol=5e-3, rtol=5e-3), \
            f"residual mismatch for case {(batch, n_obj, in_size, out_size)}"

    print("KERNEL_OK")
</pallas_src>

<mosaic_0001>
module attributes {stable_mosaic.version = 11 : i64} {
  func.func @_propagator_kernel(%arg0: i32, %arg1: i32, %arg2: i32, %arg3: memref<16x128xbf16, #tpu.memory_space<vmem>>, %arg4: memref<128x128xbf16, #tpu.memory_space<vmem>>, %arg5: memref<1x128xf32, #tpu.memory_space<vmem>>, %arg6: memref<16x128xf32, #tpu.memory_space<vmem>>, %arg7: memref<16x128xf32, #tpu.memory_space<vmem>>) attributes {dimension_semantics = [#tpu.dimension_semantics<parallel>, #tpu.dimension_semantics<parallel>, #tpu.dimension_semantics<arbitrary>], iteration_bounds = array<i64: 1, 1, 1>, scalar_prefetch = 0 : i64, scratch_operands = 1 : i64, tpu.core_type = #tpu.core_type<tc>, window_params = [{transform_indices = @transform_0, window_bounds = array<i64: 16, 128>}, {transform_indices = @transform_1, window_bounds = array<i64: 128, 128>}, {transform_indices = @transform_2, window_bounds = array<i64: 1, 128>}, {transform_indices = @transform_3, window_bounds = array<i64: 16, 128>}]} {
    %c0_i32 = arith.constant 0 : i32
    %0 = arith.cmpi eq, %arg2, %c0_i32 : i32
    %1 = arith.extui %0 : i1 to i32
    %c0_i32_0 = arith.constant 0 : i32
    %2 = arith.cmpi ne, %1, %c0_i32_0 : i32
    scf.if %2 {
      %cst_10 = arith.constant 0.000000e+00 : f32
      %12 = vector.broadcast %cst_10 : f32 to vector<16x128xf32>
      %c0_11 = arith.constant 0 : index
      %c0_12 = arith.constant 0 : index
      %13 = vector.load %arg7[%c0_11, %c0_12] : memref<16x128xf32, #tpu.memory_space<vmem>>, vector<16x128xf32>
      tpu.vector_store %arg7[%c0_11, %c0_12], %12 {strides = array<i32>} : memref<16x128xf32, #tpu.memory_space<vmem>>, vector<16x128xf32>,
    } else {
    }
    %c0 = arith.constant 0 : index
    %c0_1 = arith.constant 0 : index
    %3 = vector.load %arg7[%c0, %c0_1] : memref<16x128xf32, #tpu.memory_space<vmem>>, vector<16x128xf32>
    %c0_2 = arith.constant 0 : index
    %c0_3 = arith.constant 0 : index
    %4 = vector.load %arg3[%c0_2, %c0_3] : memref<16x128xbf16, #tpu.memory_space<vmem>>, vector<16x128xbf16>
    %c0_4 = arith.constant 0 : index
    %c0_5 = arith.constant 0 : index
    %5 = vector.load %arg4[%c0_4, %c0_5] : memref<128x128xbf16, #tpu.memory_space<vmem>>, vector<128x128xbf16>
    %cst = arith.constant dense<0.000000e+00> : vector<16x128xf32>
    %6 = tpu.matmul %4, %5, %cst {dimension_numbers = #tpu.dot_dimension_numbers<[1], [0], [0], [1], [0, 0, 1, 1], [], []>} : vector<16x128xbf16>, vector<128x128xbf16>, vector<16x128xf32> -> vector<16x128xf32>
    %7 = arith.addf %3, %6 : vector<16x128xf32>
    %c0_6 = arith.constant 0 : index
    %c0_7 = arith.constant 0 : index
    %8 = vector.load %arg7[%c0_6, %c0_7] : memref<16x128xf32, #tpu.memory_space<vmem>>, vector<16x128xf32>
    tpu.vector_store %arg7[%c0_6, %c0_7], %7 {strides = array<i32>} : memref<16x128xf32, #tpu.memory_space<vmem>>, vector<16x128xf32>,
    %c0_i32_8 = arith.constant 0 : i32
    %9 = arith.cmpi eq, %arg2, %c0_i32_8 : i32
    %10 = arith.extui %9 : i1 to i32
    %c0_i32_9 = arith.constant 0 : i32
    %11 = arith.cmpi ne, %10, %c0_i32_9 : i32
    scf.if %11 {
      %c0_10 = arith.constant 0 : index
      %c0_11 = arith.constant 0 : index
      %12 = vector.load %arg7[%c0_10, %c0_11] : memref<16x128xf32, #tpu.memory_space<vmem>>, vector<16x128xf32>
      %c0_12 = arith.constant 0 : index
      %c0_13 = arith.constant 0 : index
      %13 = vector.load %arg5[%c0_12, %c0_13] : memref<1x128xf32, #tpu.memory_space<vmem>>, vector<1x128xf32>
      %14 = vector.broadcast %13 : vector<1x128xf32> to vector<16x128xf32>
      %15 = arith.addf %12, %14 : vector<16x128xf32>
      %cst_14 = arith.constant 0.000000e+00 : f32
      %16 = vector.broadcast %cst_14 : f32 to vector<16x128xf32>
      %17 = arith.maximumf %15, %16 : vector<16x128xf32>
      %c0_15 = arith.constant 0 : index
      %c0_16 = arith.constant 0 : index
      %18 = vector.load %arg6[%c0_15, %c0_16] : memref<16x128xf32, #tpu.memory_space<vmem>>, vector<16x128xf32>
      tpu.vector_store %arg6[%c0_15, %c0_16], %17 {strides = array<i32>} : memref<16x128xf32, #tpu.memory_space<vmem>>, vector<16x128xf32>,
    } else {
    }
    return
  }
  func.func @transform_0(%arg0: i32, %arg1: i32, %arg2: i32) -> (i32, i32) {
    %c0_i32 = arith.constant 0 : i32
    return %arg0, %arg2 : i32, i32
  }
  func.func @transform_1(%arg0: i32, %arg1: i32, %arg2: i32) -> (i32, i32) {
    %c0_i32 = arith.constant 0 : i32
    return %arg2, %arg1 : i32, i32
  }
  func.func @transform_2(%arg0: i32, %arg1: i32, %arg2: i32) -> (i32, i32) {
    %c0_i32 = arith.constant 0 : i32
    %c0_i32_0 = arith.constant 0 : i32
    return %c0_i32, %arg1 : i32, i32
  }
  func.func @transform_3(%arg0: i32, %arg1: i32, %arg2: i32) -> (i32, i32) {
    %c0_i32 = arith.constant 0 : i32
    return %arg0, %arg1 : i32, i32
  }
}

</mosaic_0001>

<bundles_post_ra>
// kernel: tpu_custom_call.1
= control target key start
LH: loop header
LB: loop body
LE: loop exit
PB: predicated region body
PF: predicated region fallthrough
CT: control target
= control target key end

     0   :  { %8 = vsyncpa [#allocation4], 0  ;;  %s350_s0 = inlined_call_operand.hbm [shape: bf16[16,128], index: 0, kind: input, shape index: {}]   ;;  %s351_s1 = inlined_call_operand.hbm [shape: bf16[128,128], index: 1, kind: input, shape index: {}]   ;;  %s352_s2 = inlined_call_operand.vmem [shape: f32[1,128], index: 2, kind: input, shape index: {}]   ;;  %s353_s3 = inlined_call_operand.hbm [shape: f32[16,128], index: 3, kind: output, shape index: {}]  }
   0x1   :  { %9 = vsyncpa [#allocation7], 0 }
   0x2   :  { %10 = vsyncpa [#allocation5], 0  ;;  %s15_s14 = sshll.u32 %s350_s0, 4  ;;  %s311_s15 = smov [#allocation3]   ;;  %s16_s14 = int_to_ptr.hbm [resolvable:$true] %s15_s14 }
   0x3   :  { %s17_s16 = sshll.u32 %s311_s15, 4  ;;  %s28_s19 = sshll.u32 %s351_s1, 4  ;;  %s18_s16 = int_to_ptr.vmem [resolvable:$true] %s17_s16  ;;  %s29_s19 = int_to_ptr.hbm [resolvable:$true] %s28_s19 }
   0x4   :  { %s312_s20 = smov 64   ;;  %s313_s21 = smov 4  }
   0x5   :  { %23 = dma.hbm_to_vmem [thread:$0]  %s16_s14, 128, %s18_s16, [#allocation4], %s312_s20, %s312_s20, %s313_s21  }
   0x6   :  { %s314_s22 = smov [#allocation6]  }
   0x7   :  { %s30_s23 = sshll.u32 %s314_s22, 4  ;;  %s31_s23 = int_to_ptr.vmem [resolvable:$true] %s30_s23 }
   0x8   :  { %36 = dma.hbm_to_vmem [thread:$0]  %s29_s19, 1024, %s31_s23, [#allocation7], %s312_s20, %s312_s20, %s313_s21  }
   0x9   :  { %305 = dma.done.wait [#allocation4], 128  }
   0xa   :  { %306 = vsyncadd [#allocation4], 4294967168 }
   0xb   :  { %307 = dma.done.wait [#allocation7], 1024  }
   0xc   :  { %308 = vsyncadd [#allocation7], 4294966272  ;;  %v224_v0 = vld [vmem:[#allocation6 + $0x38] sm:$0xff]  ;;  %v223_v1 = vld [vmem:[#allocation6 + $0x30] sm:$0xff]  ;;  %s315_s24 = smov [#allocation8]   ;;  %s166_s28 = sshll.u32 %s353_s3, 4  ;;  %s167_s28 = int_to_ptr.hbm [resolvable:$true] %s166_s28 }
   0xd   :  { %127 = vmatpush.bf16.msra.mxu0 %v224_v0  ;;  %v222_v2 = vld [vmem:[#allocation6 + $0x28] sm:$0xff]  ;;  %v221_v3 = vld [vmem:[#allocation6 + $0x20] sm:$0xff]  ;;  %v220_v4 = vld [vmem:[#allocation6 + $0x18] sm:$0xff]  ;;  %s164_s25 = sshll.u32 %s315_s24, 4  ;;  %s316_s29 = smov 128   ;;  %s165_s25 = int_to_ptr.vmem [resolvable:$true] %s164_s25 }
   0xe   :  { %v219_v5 = vld [vmem:[#allocation6 + $0x10] sm:$0xff]  ;;  %v218_v6 = vld [vmem:[#allocation6 + $0x8] sm:$0xff]  ;;  %v217_v7 = vld [vmem:[#allocation6] sm:$0xff]  ;;  %s317_s30 = smov 8  }
   0xf   :  { %v216_v8 = vld [vmem:[#allocation3] sm:$0xff] }
  0x10   :  { %v232_v9 = vld [vmem:[%s352_s2] ss:$0 sm:$0xff] }
  0x11   :  { %128 = vmatpush.bf16.msra.mxu0 %v223_v1 }
  0x15   :  { %129 = vmatpush.bf16.msra.mxu0 %v222_v2 }
  0x19   :  { %130 = vmatpush.bf16.msra.mxu0 %v221_v3 }
  0x1d   :  { %131 = vmatpush.bf16.msra.mxu0 %v220_v4 }
  0x21   :  { %132 = vmatpush.bf16.msra.mxu0 %v219_v5 }
  0x25   :  { %133 = vmatpush.bf16.msra.mxu0 %v218_v6 }
  0x29   :  { %134 = vmatpush.bf16.msra.mxu0 %v217_v7 }
  0x2c   :  { %135 = vmatmul.bf16.vlgmr.msra.gmra.mxu0 %v216_v8 }
  0xa9   :  { %v136_v10 = vpop.f32.mrf.mxu0 }
  0xaa   :  { %v154_v11 = vadd.f32 %v232_v9, %v136_v10 }
  0xac   :  { %v156_v12 = vmax.f32 %v154_v11, 0.0 }
  0xae   :  { %158 = vst [vmem:[#allocation8] sm:$0xff] %v156_v12 }
  0xb1   :  { %v138_v13 = vpop.f32.mrf.mxu0 }
  0xb2   :  { %v155_v14 = vadd.f32 %v232_v9, %v138_v13 }
  0xb4   :  { %v157_v15 = vmax.f32 %v155_v14, 0.0 }
  0xb6   :  { %159 = vst [vmem:[#allocation8 + $0x8] sm:$0xff] %v157_v15 }
  0xb7   :  { %172 = dma.vmem_to_hbm [thread:$0]  %s165_s25, 256, %s167_s28, [#allocation5], %s316_s29, %s316_s29, %s317_s30  }
  0xb8   :  { %309 = dma.done.wait [#allocation5], 256  }
  0xb9   :  { %310 = vsyncadd [#allocation5], 4294967040 }
  0xba   :  { %177 = vsyncpa [#allocation4], 1 }
  0xbb   :  { %178 = vsyncpa [#allocation7], 1 }
  0xbc   :  { %179 = vsyncpa [#allocation5], 1 }

</bundles_post_ra>
